<compile_context>
chip_gen: v7x
topology: tpu7x:2x2x1
jax: 0.10.0
libtpu: 0.0.40
codegen_flags: <defaults>
</compile_context>

<pallas_src>
import jax
import jax.numpy as jnp
from jax.experimental import pallas as pl
from jax.experimental.pallas import tpu as pltpu

_LANE = 128
_SUBLANE = 16                          # bf16-friendly row multiple
_VMEM_BUDGET = 24 * 1024 * 1024        # per-step working-set target (all gens)
_VMEM_LIMIT = 32 * 1024 * 1024         # scoped VMEM request (<= physical everywhere)
_W_RESIDENT_BUDGET = 8 * 1024 * 1024   # double-buffered weight slab budget


def _round_up(x, m):
    return ((x + m - 1) // m) * m


def _proj_kernel(x_ref, w_ref, b_ref, o_ref):
    # x_ref: (tm, K)  w_ref: (K, tn)  b_ref: (1, tn)  o_ref: (tm, tn)
    acc = jnp.dot(x_ref[...], w_ref[...], preferred_element_type=jnp.float32)
    o_ref[...] = (acc + b_ref[...]).astype(o_ref.dtype)


def patch_embed_matmul(patches, w_mat, bias, *, out_dtype=jnp.float32,
                       tm_max=512):
    """patches: (M, K), w_mat: (K, N), bias: (1, N) -> (M, N) in out_dtype.

    M, N and K are zero-padded to tile multiples internally (exact: zero
    rows/cols contribute nothing) and the result is sliced back to (M, N).
    No divisibility requirements on the caller side.
    """
    M, K = patches.shape
    Kw, N = w_mat.shape
    assert K == Kw and bias.shape == (1, N)

    in_it = patches.dtype.itemsize
    w_it = w_mat.dtype.itemsize
    b_it = bias.dtype.itemsize
    out_it = jnp.dtype(out_dtype).itemsize

    # ---- pad K / N up to lane multiples (clean MXU / vreg tiling) ----
    K_pad = _round_up(K, _LANE)
    N_pad = _round_up(N, _LANE)
    if K_pad != K:
        patches = jnp.pad(patches, ((0, 0), (0, K_pad - K)))
        w_mat = jnp.pad(w_mat, ((0, K_pad - K), (0, 0)))
    if N_pad != N:
        w_mat = jnp.pad(w_mat, ((0, 0), (0, N_pad - N)))
        bias = jnp.pad(bias, ((0, 0), (0, N_pad - N)))

    # ---- weight placement: fully VMEM-resident if it fits ----
    weight_resident = 2 * K_pad * N_pad * w_it <= _W_RESIDENT_BUDGET
    if weight_resident:
        tn = N_pad
    else:
        # Weight-stationary fallback: largest 128-multiple slab dividing N_pad
        # whose double-buffered footprint fits the budget (128 always works).
        tn = _LANE
        for cand in range(N_pad, _LANE - 1, -_LANE):
            if N_pad % cand == 0 and 2 * K_pad * cand * w_it <= _W_RESIDENT_BUDGET:
                tn = cand
                break

    # ---- row-tile selection under an explicit VMEM budget ----
    def working_set(tm):
        return (2 * tm * K_pad * in_it       # x tile (double-buffered)
                + 2 * K_pad * tn * w_it      # weight slab
                + 2 * tn * b_it              # bias slab
                + 2 * tm * tn * out_it)      # output tile

    M_min = _round_up(M, _SUBLANE)
    tm = _round_up(min(tm_max, M_min), _SUBLANE)
    while tm > _SUBLANE and working_set(tm) > _VMEM_BUDGET:
        tm = max(_SUBLANE, _round_up(tm // 2, _SUBLANE))
    # v7x has 2 TensorCores sharding the parallel M axis: keep >= 2 blocks.
    if M_min // tm < 2 and M_min >= 2 * _SUBLANE:
        tm = _round_up((M_min + 1) // 2, _SUBLANE)
    M_pad = _round_up(M, tm)
    if M_pad != M:
        patches = jnp.pad(patches, ((0, M_pad - M), (0, 0)))

    n_m = M_pad // tm
    n_n = N_pad // tn

    if weight_resident:
        # 1-D grid over M; weight/bias block index never changes -> DMA'd once.
        grid = (n_m,)
        in_specs = [
            pl.BlockSpec((tm, K_pad), lambda i: (i, 0)),
            pl.BlockSpec((K_pad, N_pad), lambda i: (0, 0)),
            pl.BlockSpec((1, N_pad), lambda i: (0, 0)),
        ]
        out_specs = pl.BlockSpec((tm, N_pad), lambda i: (i, 0))
        dim_sem = ("parallel",)
        x_reads = 1
    else:
        # N outer / M inner -> the weight slab changes only on the outer axis.
        grid = (n_n, n_m)
        in_specs = [
            pl.BlockSpec((tm, K_pad), lambda j, i: (i, 0)),
            pl.BlockSpec((K_pad, tn), lambda j, i: (0, j)),
            pl.BlockSpec((1, tn), lambda j, i: (0, j)),
        ]
        out_specs = pl.BlockSpec((tm, tn), lambda j, i: (i, j))
        dim_sem = ("parallel", "parallel")
        x_reads = n_n

    bytes_accessed = (x_reads * M_pad * K_pad * in_it
                      + K_pad * N_pad * w_it
                      + N_pad * b_it
                      + M_pad * N_pad * out_it)

    out = pl.pallas_call(
        _proj_kernel,
        out_shape=jax.ShapeDtypeStruct((M_pad, N_pad), out_dtype),
        grid_spec=pltpu.PrefetchScalarGridSpec(
            num_scalar_prefetch=0,
            grid=grid,
            in_specs=in_specs,
            out_specs=out_specs,
        ),
        compiler_params=pltpu.CompilerParams(
            dimension_semantics=dim_sem,
            vmem_limit_bytes=_VMEM_LIMIT),
        cost_estimate=pl.CostEstimate(
            flops=2 * M_pad * K_pad * N_pad,
            transcendentals=0,
            bytes_accessed=bytes_accessed),
    )(patches, w_mat, bias)
    return out[:M, :N]


def patch_embed_forward(x, weight, bias, *, patch_size, tubelet_size,
                        compute_dtype=jnp.bfloat16, out_dtype=None):
    """
    x:      (B, C, T, H, W)          -- NCDHW, same as PyTorch Conv3d input
    weight: (E, C, k, p, p)          -- nn.Conv3d weight layout
    bias:   (E,)
    returns (B, E, T//k, H//p, W//p) -- same as PyTorch Conv3d output

    compute_dtype: matmul-input dtype (bf16 halves HBM traffic and doubles
    MXU rate on v6e/v7x); accumulation is always f32.
    out_dtype: kernel output dtype; defaults to x.dtype. Pass compute_dtype to
    halve the writeback when the downstream consumer accepts bf16.
    """
    B, C, T, H, W = x.shape
    E = weight.shape[0]
    p = patch_size
    k = tubelet_size
    Tp, Hp, Wp = T // k, H // p, W // p
    if out_dtype is None:
        out_dtype = x.dtype

    # --- glue: non-overlapping patch extraction (reshape/transpose) ---
    # TODO(synk): this 8-D transpose (+ cast) is a full extra HBM round-trip of
    # x; accept channels-last (NDHWC) input, or fold extraction into the
    # kernel's input DMA (allow_input_fusion / Element BlockSpecs) to remove it.
    xp = x.reshape(B, C, Tp, k, Hp, p, Wp, p)
    xp = xp.transpose(0, 2, 4, 6, 1, 3, 5, 7)        # (B,Tp,Hp,Wp,C,k,p,p)
    patches = xp.reshape(B * Tp * Hp * Wp, C * k * p * p)

    # Conv3d weight (E, C, k, p, p) -> (K, E) so that out = patches @ w_mat
    w_mat = weight.reshape(E, C * k * p * p).T
    b_row = bias.reshape(1, E).astype(jnp.float32)

    if compute_dtype is not None:
        patches = patches.astype(compute_dtype)
        w_mat = w_mat.astype(compute_dtype)

    # --- hot path: tiled Pallas matmul + bias (f32 accumulation) ---
    out = patch_embed_matmul(patches, w_mat, b_row, out_dtype=out_dtype)

    # --- glue: back to PyTorch NCDHW-style output ---
    out = out.reshape(B, Tp, Hp, Wp, E).transpose(0, 4, 1, 2, 3)
    return out


if __name__ == "__main__":
    # Small shapes consistent with the module: img_size=16, patch_size=8,
    # kernel_size (tubelet) = 1, in_chans=4, embed_dim=32, batch=2, T=2.
    B, C, T, H, W = 2, 4, 2, 16, 16
    patch_size = 8
    tubelet = 1
    embed_dim = 32

    key = jax.random.PRNGKey(0)
    kx, kw, kb = jax.random.split(key, 3)

    x = jax.random.normal(kx, (B, C, T, H, W), dtype=jnp.float32)
    fan_in = C * tubelet * patch_size * patch_size
    weight = jax.random.normal(
        kw, (embed_dim, C, tubelet, patch_size, patch_size),
        dtype=jnp.float32) * (1.0 / jnp.sqrt(fan_in))
    bias = jax.random.normal(kb, (embed_dim,), dtype=jnp.float32) * 0.01

    # Reference: lax conv (same semantics as nn.Conv3d with kernel==stride).
    ref = jax.lax.conv_general_dilated(
        x, weight,
        window_strides=(tubelet, patch_size, patch_size),
        padding="VALID",
        dimension_numbers=("NCDHW", "OIDHW", "NCDHW"),
    ) + bias.reshape(1, embed_dim, 1, 1, 1)

    out_shape = (B, embed_dim, T // tubelet, H // patch_size, W // patch_size)

    # 1) f32 compute path: tight numerical check.
    out_f32 = patch_embed_forward(
        x, weight, bias, patch_size=patch_size, tubelet_size=tubelet,
        compute_dtype=jnp.float32)
    out_f32 = jax.block_until_ready(out_f32)
    assert out_f32.shape == out_shape
    assert jnp.allclose(out_f32, ref, atol=1e-4, rtol=1e-4)

    # 2) bf16 compute, f32 output (default perf path): relaxed check.
    out_bf16 = patch_embed_forward(
        x, weight, bias, patch_size=patch_size, tubelet_size=tubelet,
        compute_dtype=jnp.bfloat16)
    out_bf16 = jax.block_until_ready(out_bf16)
    assert out_bf16.shape == out_shape
    assert jnp.allclose(out_bf16, ref, atol=2e-2, rtol=2e-2)

    # 3) bf16 compute + bf16 output (halved writeback): relaxed check.
    out_bf16o = patch_embed_forward(
        x, weight, bias, patch_size=patch_size, tubelet_size=tubelet,
        compute_dtype=jnp.bfloat16, out_dtype=jnp.bfloat16)
    out_bf16o = jax.block_until_ready(out_bf16o)
    assert out_bf16o.shape == out_shape
    assert out_bf16o.dtype == jnp.bfloat16
    assert jnp.allclose(out_bf16o.astype(jnp.float32), ref, atol=3e-2, rtol=3e-2)

    print("KERNEL_OK")
</pallas_src>

<mosaic_0001>
module attributes {stable_mosaic.version = 11 : i64} {
  func.func @_proj_kernel(%arg0: i32, %arg1: memref<16x256xf32, #tpu.memory_space<vmem>>, %arg2: memref<256x128xf32, #tpu.memory_space<vmem>>, %arg3: memref<1x128xf32, #tpu.memory_space<vmem>>, %arg4: memref<16x128xf32, #tpu.memory_space<vmem>>) attributes {dimension_semantics = [#tpu.dimension_semantics<parallel>], iteration_bounds = array<i64: 1>, scalar_prefetch = 0 : i64, scratch_operands = 0 : i64, tpu.core_type = #tpu.core_type<tc>, window_params = [{transform_indices = @transform_0, window_bounds = array<i64: 16, 256>}, {pipeline_mode = #tpu.pipeline_mode<synchronous>, transform_indices = @transform_1, window_bounds = array<i64: 256, 128>}, {pipeline_mode = #tpu.pipeline_mode<synchronous>, transform_indices = @transform_2, window_bounds = array<i64: 1, 128>}, {transform_indices = @transform_3, window_bounds = array<i64: 16, 128>}]} {
    %c0 = arith.constant 0 : index
    %c0_0 = arith.constant 0 : index
    %0 = vector.load %arg1[%c0, %c0_0] : memref<16x256xf32, #tpu.memory_space<vmem>>, vector<16x256xf32>
    %c0_1 = arith.constant 0 : index
    %c0_2 = arith.constant 0 : index
    %1 = vector.load %arg2[%c0_1, %c0_2] : memref<256x128xf32, #tpu.memory_space<vmem>>, vector<256x128xf32>
    %cst = arith.constant dense<0.000000e+00> : vector<16x128xf32>
    %2 = tpu.matmul %0, %1, %cst {dimension_numbers = #tpu.dot_dimension_numbers<[1], [0], [0], [1], [0, 0, 1, 1], [], []>} : vector<16x256xf32>, vector<256x128xf32>, vector<16x128xf32> -> vector<16x128xf32>
    %c0_3 = arith.constant 0 : index
    %c0_4 = arith.constant 0 : index
    %3 = vector.load %arg3[%c0_3, %c0_4] : memref<1x128xf32, #tpu.memory_space<vmem>>, vector<1x128xf32>
    %4 = vector.broadcast %3 : vector<1x128xf32> to vector<16x128xf32>
    %5 = arith.addf %2, %4 : vector<16x128xf32>
    %c0_5 = arith.constant 0 : index
    %c0_6 = arith.constant 0 : index
    %6 = vector.load %arg4[%c0_5, %c0_6] : memref<16x128xf32, #tpu.memory_space<vmem>>, vector<16x128xf32>
    tpu.vector_store %arg4[%c0_5, %c0_6], %5 {strides = array<i32>} : memref<16x128xf32, #tpu.memory_space<vmem>>, vector<16x128xf32>,
    return
  }
  func.func @transform_0(%arg0: i32) -> (i32, i32) {
    %c0_i32 = arith.constant 0 : i32
    %c0_i32_0 = arith.constant 0 : i32
    return %arg0, %c0_i32 : i32, i32
  }
  func.func @transform_1(%arg0: i32) -> (i32, i32) {
    %c0_i32 = arith.constant 0 : i32
    %c0_i32_0 = arith.constant 0 : i32
    %c0_i32_1 = arith.constant 0 : i32
    return %c0_i32, %c0_i32_0 : i32, i32
  }
  func.func @transform_2(%arg0: i32) -> (i32, i32) {
    %c0_i32 = arith.constant 0 : i32
    %c0_i32_0 = arith.constant 0 : i32
    %c0_i32_1 = arith.constant 0 : i32
    return %c0_i32, %c0_i32_0 : i32, i32
  }
  func.func @transform_3(%arg0: i32) -> (i32, i32) {
    %c0_i32 = arith.constant 0 : i32
    %c0_i32_0 = arith.constant 0 : i32
    return %arg0, %c0_i32 : i32, i32
  }
}

</mosaic_0001>

<bundles_post_ra>
// kernel: tpu_custom_call.1
= control target key start
LH: loop header
LB: loop body
LE: loop exit
PB: predicated region body
PF: predicated region fallthrough
CT: control target
= control target key end

     0   :  { %8 = vsyncpa [#allocation3], 0  ;;  %s419_s0 = inlined_call_operand.hbm [shape: f32[16,256], index: 0, kind: input, shape index: {}]   ;;  %s420_s1 = inlined_call_operand.hbm [shape: f32[256,128], index: 1, kind: input, shape index: {}]   ;;  %s421_s2 = inlined_call_operand.vmem [shape: f32[1,128], index: 2, kind: input, shape index: {}]   ;;  %s422_s3 = inlined_call_operand.hbm [shape: f32[16,128], index: 3, kind: output, shape index: {}]  }
   0x1   :  { %9 = vsyncpa [#allocation6], 0 }
   0x2   :  { %10 = vsyncpa [#allocation4], 0  ;;  %s347_s12 = smov [#allocation2]   ;;  %s275_s16 = scalar_lea.hbm %s419_s0, 512 }
   0x3   :  { %s16_s13 = sshll.u32 %s347_s12, 4  ;;  %p276_p0 = scmp.ne.s32.totalorder %s419_s0, %s275_s16  ;;  %s17_s13 = int_to_ptr.vmem [resolvable:$true] %s16_s13 }
   0x4   :  { %p279_p1 = scmp.lt.u32.totalorder %s275_s16, %s419_s0 }
   0x6   :  { %p281_p2 = pnand %p279_p1, %p276_p0 }
   0x8   :  { %284 = shalt.err (!%p281_p2)
}
   0x9   :  { %s285_s21 = scalar_lea.vmem %s17_s13, 512  ;;  %p290_p4 = scmp.lt.s32.totalorder %s17_s13, %s17_s13 }
   0xa   :  { %p286_p3 = scmp.ne.s32.totalorder %s17_s13, %s285_s21  ;;  %p291_p5 = scmp.lt.s32.totalorder %s285_s21, %s285_s21 }
   0xc   :  { %p292_p6 = por %p291_p5, %p290_p4 }
   0xe   :  { %p293_p7 = pnand %p292_p6, %p286_p3 }
  0x10   :  { %296 = shalt.err (!%p293_p7)
}
  0x11   :  { %s348_s22 = smov 256   ;;  %s349_s23 = smov 16  }
  0x12   :  { %22 = dma.hbm_to_vmem [thread:$0]  %s419_s0, 512, %s17_s13, [#allocation3], %s348_s22, %s348_s22, %s349_s23  }
  0x13   :  { %s350_s26 = smov [#allocation5]   ;;  %s297_s30 = scalar_lea.hbm %s420_s1, 4096 }
  0x14   :  { %s28_s27 = sshll.u32 %s350_s26, 4  ;;  %p298_p8 = scmp.ne.s32.totalorder %s420_s1, %s297_s30  ;;  %s29_s27 = int_to_ptr.vmem [resolvable:$true] %s28_s27 }
  0x15   :  { %p301_p9 = scmp.lt.u32.totalorder %s297_s30, %s420_s1 }
  0x17   :  { %p303_p10 = pnand %p301_p9, %p298_p8 }
  0x19   :  { %306 = shalt.err (!%p303_p10)
}
  0x1a   :  { %s307_s8 = scalar_lea.vmem %s29_s27, 4096  ;;  %p312_p12 = scmp.lt.s32.totalorder %s29_s27, %s29_s27 }
  0x1b   :  { %p308_p11 = scmp.ne.s32.totalorder %s29_s27, %s307_s8  ;;  %p313_p13 = scmp.lt.s32.totalorder %s307_s8, %s307_s8 }
  0x1d   :  { %p314_p0 = por %p313_p13, %p312_p12 }
  0x1f   :  { %p315_p1 = pnand %p314_p0, %p308_p11 }
  0x21   :  { %318 = shalt.err (!%p315_p1)
}
  0x22   :  { %s351_s0 = smov 128   ;;  %s352_s9 = smov 8  }
  0x23   :  { %34 = dma.hbm_to_vmem [thread:$0]  %s420_s1, 4096, %s29_s27, [#allocation6], %s351_s0, %s351_s0, %s352_s9  }
  0x24   :  { %341 = dma.done.wait [#allocation3], 512  }
  0x25   :  { %342 = vsyncadd [#allocation3], 4294966784 }
  0x26   :  { %343 = dma.done.wait [#allocation6], 4096  }
  0x27   :  { %344 = vsyncadd [#allocation6], 4294963200  ;;  %v63_v0 = vld [vmem:[#allocation5 + $0x80] sm:$0xff]  ;;  %v64_v1 = vld [vmem:[#allocation5 + $0x88] sm:$0xff]  ;;  %s353_s13 = smov [#allocation7]  }
  0x28   :  { %v47_v2 = vld [vmem:[#allocation5] sm:$0xff]  ;;  %v220_v3 = vpack.c.bf16 %v64_v1, %v63_v0  ;;  %v48_v4 = vld [vmem:[#allocation5 + $0x8] sm:$0xff]  ;;  %v65_v5 = vld [vmem:[#allocation5 + $0x90] sm:$0xff]  ;;  %s168_s14 = sshll.u32 %s353_s13, 4  ;;  %s169_s14 = int_to_ptr.vmem [resolvable:$true] %s168_s14 }
  0x29   :  { %v66_v6 = vld [vmem:[#allocation5 + $0x98] sm:$0xff]  ;;  %v222_v7 = vpack.c.bf16 %v48_v4, %v47_v2  ;;  %v49_v9 = vld [vmem:[#allocation5 + $0x10] sm:$0xff]  ;;  %v67_v11 = vld [vmem:[#allocation5 + $0xa0] sm:$0xff]  ;;  %s319_s15 = scalar_lea.vmem %s169_s14, 256  ;;  %p324_p3 = scmp.lt.s32.totalorder %s169_s14, %s169_s14 }
  0x2a   :  { %v224_v8 = vpack.c.bf16 %v66_v6, %v65_v5  ;;  %v50_v10 = vld [vmem:[#allocation5 + $0x18] sm:$0xff]  ;;  %221 = vmatprep.subr.bf16.mxu0 %v220_v3  ;;  %252 = vmatprep.subr.bf16.mxu1 %v220_v3  ;;  %v68_v12 = vld [vmem:[#allocation5 + $0xa8] sm:$0xff]  ;;  %v51_v15 = vld [vmem:[#allocation5 + $0x20] sm:$0xff]  ;;  %p320_p2 = scmp.ne.s32.totalorder %s169_s14, %s319_s15  ;;  %p325_p4 = scmp.lt.s32.totalorder %s319_s15, %s319_s15 }
  0x2b   :  { %223 = vmatpush3.bf16.msra.mxu0 %v222_v7  ;;  %260 = vmatpush3.bf16.msra.mxu1 %v222_v7  ;;  %v226_v13 = vpack.c.bf16 %v50_v10, %v49_v9  ;;  %v228_v14 = vpack.c.bf16 %v68_v12, %v67_v11  ;;  %v52_v16 = vld [vmem:[#allocation5 + $0x28] sm:$0xff]  ;;  %v69_v17 = vld [vmem:[#allocation5 + $0xb0] sm:$0xff]  ;;  %v70_v18 = vld [vmem:[#allocation5 + $0xb8] sm:$0xff] }
  0x2c   :  { %225 = vmatprep.subr.bf16.mxu0 %v224_v8  ;;  %253 = vmatprep.subr.bf16.mxu1 %v224_v8  ;;  %v230_v19 = vpack.c.bf16 %v52_v16, %v51_v15  ;;  %v232_v20 = vpack.c.bf16 %v70_v18, %v69_v17  ;;  %v53_v21 = vld [vmem:[#allocation5 + $0x30] sm:$0xff]  ;;  %v54_v22 = vld [vmem:[#allocation5 + $0x38] sm:$0xff]  ;;  %v71_v23 = vld [vmem:[#allocation5 + $0xc0] sm:$0xff]  ;;  %p326_p5 = por %p325_p4, %p324_p3 }
  0x2d   :  { %v72_v24 = vld [vmem:[#allocation5 + $0xc8] sm:$0xff]  ;;  %v46_v26 = vld [vmem:[#allocation2 + $0x18] sm:$0xff]  ;;  %v234_v27 = vpack.c.bf16 %v54_v22, %v53_v21  ;;  %v55_v29 = vld [vmem:[#allocation5 + $0x40] sm:$0xff] }
  0x2e   :  { %v44_v25 = vld [vmem:[#allocation2 + $0x8] sm:$0xff]  ;;  %v236_v28 = vpack.c.bf16 %v72_v24, %v71_v23  ;;  %v73_v31 = vld [vmem:[#allocation5 + $0xd0] sm:$0xff]  ;;  %v74_v32 = vld [vmem:[#allocation5 + $0xd8] sm:$0xff]  ;;  %155 = vmatprep.mubr.f32.mxu1 %v46_v26  ;;  %p327_p6 = pnand %p326_p5, %p320_p2 }
  0x2f   :  { %227 = vmatpush3.bf16.msra.mxu0 %v226_v13  ;;  %261 = vmatpush3.bf16.msra.mxu1 %v226_v13  ;;  %v56_v30 = vld [vmem:[#allocation5 + $0x48] sm:$0xff]  ;;  %v240_v34 = vpack.c.bf16 %v74_v32, %v73_v31  ;;  %v57_v35 = vld [vmem:[#allocation5 + $0x50] sm:$0xff]  ;;  %v58_v36 = vld [vmem:[#allocation5 + $0x58] sm:$0xff] }
  0x30   :  { %229 = vmatprep.subr.bf16.mxu0 %v228_v14  ;;  %254 = vmatprep.subr.bf16.mxu1 %v228_v14  ;;  %v238_v33 = vpack.c.bf16 %v56_v30, %v55_v29  ;;  %v75_v37 = vld [vmem:[#allocation5 + $0xe0] sm:$0xff]  ;;  %v76_v38 = vld [vmem:[#allocation5 + $0xe8] sm:$0xff]  ;;  %v242_v39 = vpack.c.bf16 %v58_v36, %v57_v35  ;;  %v77_v43 = vld [vmem:[#allocation5 + $0xf0] sm:$0xff] }
  0x31   :  { %150 = vmatprep.mubr.f32.mxu0 %v44_v25  ;;  %v244_v40 = vpack.c.bf16 %v76_v38, %v75_v37  ;;  %v59_v41 = vld [vmem:[#allocation5 + $0x60] sm:$0xff]  ;;  %v60_v42 = vld [vmem:[#allocation5 + $0x68] sm:$0xff]  ;;  %v78_v44 = vld [vmem:[#allocation5 + $0xf8] sm:$0xff] }
  0x32   :  { %v246_v45 = vpack.c.bf16 %v60_v42, %v59_v41  ;;  %v248_v46 = vpack.c.bf16 %v78_v44, %v77_v43  ;;  %v61_v47 = vld [vmem:[#allocation5 + $0x70] sm:$0xff]  ;;  %v62_v48 = vld [vmem:[#allocation5 + $0x78] sm:$0xff]  ;;  %v43_v50 = vld [vmem:[#allocation2] sm:$0xff] }
  0x33   :  { %231 = vmatpush3.bf16.msra.mxu0 %v230_v19  ;;  %262 = vmatpush3.bf16.msra.mxu1 %v230_v19  ;;  %v250_v49 = vpack.c.bf16 %v62_v48, %v61_v47  ;;  %v45_v51 = vld [vmem:[#allocation2 + $0x10] sm:$0xff]  ;;  %v181_v54 = vld [vmem:[%s421_s2] ss:$0 sm:$0xff] }
  0x34   :  { %233 = vmatprep.subr.bf16.mxu0 %v232_v20  ;;  %255 = vmatprep.subr.bf16.mxu1 %v232_v20 }
  0x37   :  { %235 = vmatpush3.bf16.msra.mxu0 %v234_v27  ;;  %263 = vmatpush3.bf16.msra.mxu1 %v234_v27 }
  0x38   :  { %237 = vmatprep.subr.bf16.mxu0 %v236_v28  ;;  %256 = vmatprep.subr.bf16.mxu1 %v236_v28 }
  0x3b   :  { %239 = vmatpush3.bf16.msra.mxu0 %v238_v33  ;;  %264 = vmatpush3.bf16.msra.mxu1 %v238_v33 }
  0x3c   :  { %241 = vmatprep.subr.bf16.mxu0 %v240_v34  ;;  %257 = vmatprep.subr.bf16.mxu1 %v240_v34 }
  0x3f   :  { %243 = vmatpush3.bf16.msra.mxu0 %v242_v39  ;;  %265 = vmatpush3.bf16.msra.mxu1 %v242_v39 }
  0x40   :  { %245 = vmatprep.subr.bf16.mxu0 %v244_v40  ;;  %258 = vmatprep.subr.bf16.mxu1 %v244_v40 }
  0x43   :  { %247 = vmatpush3.bf16.msra.mxu0 %v246_v45  ;;  %266 = vmatpush3.bf16.msra.mxu1 %v246_v45 }
  0x44   :  { %249 = vmatprep.subr.bf16.mxu0 %v248_v46  ;;  %259 = vmatprep.subr.bf16.mxu1 %v248_v46 }
  0x47   :  { %251 = vmatpush3.bf16.msra.mxu0 %v250_v49  ;;  %267 = vmatpush3.bf16.msra.mxu1 %v250_v49 }
  0x4a   :  { %151 = vmatmul.mubr.f32.vlgmr.msra.gmra.mrb[0].mxu0 %v43_v50  ;;  %156 = vmatmul.mubr.f32.vlgmr.msra.gmra.mrb[0].mxu1 %v45_v51 }
 0x11d   :  { %v214_v52 = vpop.f32.mrb[0].mxu0  ;;  %v217_v53 = vpop.f32.mrb[0].mxu1 }
 0x11e   :  { %v215_v55 = vpop.f32.mrb[1].mxu0  ;;  %v218_v56 = vpop.f32.mrb[1].mxu1 }
 0x11f   :  { %v216_v57 = vadd.f32 %v215_v55, %v214_v52  ;;  %v219_v58 = vadd.f32 %v218_v56, %v217_v53 }
 0x121   :  { %v153_v59 = vadd.f32 %v216_v57, %v181_v54  ;;  %v158_v60 = vadd.f32 %v219_v58, %v181_v54 }
 0x123   :  { %161 = vst [vmem:[#allocation7] sm:$0xff] %v153_v59  ;;  %162 = vst [vmem:[#allocation7 + $0x8] sm:$0xff] %v158_v60 }
 0x124   :  { %330 = shalt.err (!%p327_p6)
}
 0x125   :  { %s331_s17 = scalar_lea.hbm %s422_s3, 256 }
 0x126   :  { %p332_p7 = scmp.ne.s32.totalorder %s422_s3, %s331_s17  ;;  %p335_p8 = scmp.lt.u32.totalorder %s331_s17, %s422_s3 }
 0x128   :  { %p337_p9 = pnand %p335_p8, %p332_p7 }
 0x12a   :  { %340 = shalt.err (!%p337_p9)
}
 0x12b   :  { %174 = dma.vmem_to_hbm [thread:$0]  %s169_s14, 256, %s422_s3, [#allocation4], %s351_s0, %s351_s0, %s352_s9  }
 0x12c   :  { %345 = dma.done.wait [#allocation4], 256  }
 0x12d   :  { %346 = vsyncadd [#allocation4], 4294967040 }
 0x12e   :  { %178 = vsyncpa [#allocation3], 1 }
 0x12f   :  { %179 = vsyncpa [#allocation6], 1 }
 0x130   :  { %180 = vsyncpa [#allocation4], 1 }

</bundles_post_ra>
